<compile_context>
chip_gen: v7x
topology: tpu7x:2x2x1
jax: 0.10.0
libtpu: 0.0.40
codegen_flags: <defaults>
</compile_context>

<pallas_src>
import functools

import jax
import jax.numpy as jnp
from jax import lax
from jax.experimental import pallas as pl
from jax.experimental.pallas import tpu as pltpu

_LANES = 128
_MAX_TILE_M = 2048  # (2048, 128) f32 block = 1 MiB; 2 inputs x 2 bufs = 4 MiB VMEM


def _round_up(x, m):
    return ((x + m - 1) // m) * m


def _sublane_multiple(dtype):
    # Rows per packed vreg tile: f32 -> 8, bf16/f16 -> 16, 1-byte floats -> 32.
    return max(8, 32 // jnp.dtype(dtype).itemsize)


def _as_tpu_float(a):
    a = jnp.asarray(a)
    if jnp.issubdtype(a.dtype, jnp.floating) and jnp.dtype(a.dtype).itemsize <= 4:
        return a
    # bool / int / f64 logits or targets: cast once in the wrapper.
    return a.astype(jnp.float32)


def _dice_bce_kernel(x_ref, t_ref, out_ref, *, tile_m, chunk_m, rows, unroll):
    """Per-tile streaming reduction.

    Writes one (1, 24, 128) f32 block per grid step:
      rows  0: 8  -> partial sum of sigmoid(x) * t   (dice intersection)
      rows  8:16  -> partial sum of sigmoid(x) + t   (dice denominator)
      rows 16:24  -> partial sum of BCE(x, t)        (numerator of the mean)
    """
    n_chunks = tile_m // chunk_m
    tile_row0 = pl.program_id(0) * tile_m

    def run(masked):
        def chunk_body(c, carry):
            acc_it, acc_pt, acc_bce = carry
            r0 = pl.multiple_of(c * chunk_m, chunk_m)
            x = x_ref[pl.ds(r0, chunk_m), :].astype(jnp.float32)
            t = t_ref[pl.ds(r0, chunk_m), :].astype(jnp.float32)
            if masked:
                # Only the final (ragged) tile is compiled with this path.
                row = tile_row0 + r0 + lax.broadcasted_iota(
                    jnp.int32, (chunk_m, 1), 0)
                valid = row < rows
                # A -100 logit with a 0 target contributes (FTZ-)exactly zero
                # to all three sums, so no further masking is needed below.
                x = jnp.where(valid, x, -100.0)
                t = jnp.where(valid, t, 0.0)

            # Numerically stable sigmoid + BCE, 2 transcendentals / element.
            e = jnp.exp(-jnp.abs(x))
            r = 1.0 / (1.0 + e)                            # exact divide
            p = jnp.where(x >= 0.0, r, e * r)              # sigmoid(x)
            sp = jnp.log(1.0 + e) + jnp.maximum(x, 0.0)    # softplus(x)
            # BCE = t*softplus(-x) + (1-t)*softplus(x) == softplus(x) - t*x;
            # one clamp == torch's -100 log clamp for binary targets.
            bce = jnp.minimum(sp - t * x, 100.0)

            def fold(v, acc):
                # (chunk_m, 128) -> (8, 128) via vreg-aligned static slices.
                for k in range(chunk_m // 8):
                    acc = acc + v[k * 8:(k + 1) * 8, :]
                return acc

            return (fold(p * t, acc_it), fold(p + t, acc_pt), fold(bce, acc_bce))

        zero = jnp.zeros((8, _LANES), jnp.float32)
        acc_it, acc_pt, acc_bce = lax.fori_loop(
            0, n_chunks, chunk_body, (zero, zero, zero),
            unroll=min(unroll, n_chunks))
        out_ref[0, 0:8, :] = acc_it
        out_ref[0, 8:16, :] = acc_pt
        out_ref[0, 16:24, :] = acc_bce

    if rows % tile_m == 0:
        run(masked=False)          # every tile full: no mask code generated
    else:
        last = pl.num_programs(0) - 1

        @pl.when(pl.program_id(0) != last)
        def _():
            run(masked=False)

        @pl.when(pl.program_id(0) == last)
        def _():
            run(masked=True)


def dice_bce_loss(inputs, targets, smooth=1.0):
    """Pallas TPU implementation of DiceBCELoss.forward."""
    x = _as_tpu_float(inputs).reshape(-1)
    t = _as_tpu_float(targets).reshape(-1)
    n = x.shape[0]

    # Lane padding only when numel is not a multiple of 128 (rare, < 128
    # padded elements).  -100 logits / 0 targets contribute nothing.
    lane_rem = n % _LANES
    if lane_rem:
        pad = _LANES - lane_rem
        x = jnp.pad(x, (0, pad), constant_values=-100.0)
        t = jnp.pad(t, (0, pad), constant_values=0.0)
    rows = x.shape[0] // _LANES

    # Chunk = packed-vreg row granularity for the widest packing of the two
    # dtypes; the in-kernel loop streams the tile chunk-by-chunk.
    chunk_m = max(_sublane_multiple(x.dtype), _sublane_multiple(t.dtype))
    # Big tiles amortize per-step overhead; keep >= 2 grid steps when possible
    # so the "parallel" axis can use both TensorCores on v7x.
    tile_m = max(chunk_m, min(_MAX_TILE_M, _round_up(pl.cdiv(rows, 2), chunk_m)))
    ntiles = pl.cdiv(rows, tile_m)
    unroll = max(1, 64 // chunk_m)   # ~64 rows of work per unrolled loop iter

    x2 = x.reshape(rows, _LANES)
    t2 = t.reshape(rows, _LANES)

    kernel = functools.partial(_dice_bce_kernel, tile_m=tile_m,
                               chunk_m=chunk_m, rows=rows, unroll=unroll)

    parts = pl.pallas_call(
        kernel,
        out_shape=jax.ShapeDtypeStruct((ntiles, 24, _LANES), jnp.float32),
        grid_spec=pltpu.PrefetchScalarGridSpec(
            num_scalar_prefetch=0,
            grid=(ntiles,),
            in_specs=[
                pl.BlockSpec((tile_m, _LANES), lambda i: (i, 0)),
                pl.BlockSpec((tile_m, _LANES), lambda i: (i, 0)),
            ],
            out_specs=pl.BlockSpec((1, 24, _LANES), lambda i: (i, 0, 0)),
        ),
        compiler_params=pltpu.CompilerParams(
            dimension_semantics=("parallel",)),
    )(x2, t2)

    # Tiny final tree-reduce + dice/bce combine in plain JAX.
    intersection = jnp.sum(parts[:, 0:8, :])
    pt_sum = jnp.sum(parts[:, 8:16, :])
    bce_sum = jnp.sum(parts[:, 16:24, :])

    smooth = jnp.float32(smooth)
    dice_loss = 1.0 - (2.0 * intersection + smooth) / (pt_sum + smooth)
    bce_mean = bce_sum / jnp.float32(n)
    return bce_mean + dice_loss


def _reference_dice_bce(inputs, targets, smooth=1.0):
    # Faithful to torch: sigmoid -> binary_cross_entropy (log clamped at -100).
    p = jax.nn.sigmoid(inputs.astype(jnp.float32)).reshape(-1)
    t = targets.astype(jnp.float32).reshape(-1)
    intersection = jnp.sum(p * t)
    dice_loss = 1.0 - (2.0 * intersection + smooth) / (jnp.sum(p) + jnp.sum(t) + smooth)
    bce = jnp.mean(-(t * jnp.maximum(jnp.log(p), -100.0)
                     + (1.0 - t) * jnp.maximum(jnp.log(1.0 - p), -100.0)))
    return bce + dice_loss


if __name__ == "__main__":
    key = jax.random.PRNGKey(0)
    k_in, k_tg = jax.random.split(key)
    # NCHW, same convention as the PyTorch module's typical segmentation input.
    inputs = jax.random.normal(k_in, (2, 4, 16, 16), dtype=jnp.float32)
    targets = (jax.random.uniform(k_tg, (2, 4, 16, 16)) > 0.5).astype(jnp.float32)

    loss = dice_bce_loss(inputs, targets, smooth=1.0)
    jax.block_until_ready(loss)

    ref = _reference_dice_bce(inputs, targets, smooth=1.0)
    assert jnp.allclose(loss, ref, rtol=1e-5, atol=1e-5), (loss, ref)

    print("KERNEL_OK")
</pallas_src>

<mosaic_0001>
module attributes {stable_mosaic.version = 11 : i64} {
  func.func @_dice_bce_kernel(%arg0: i32, %arg1: memref<8x128xf32, #tpu.memory_space<vmem>>, %arg2: memref<8x128xf32, #tpu.memory_space<vmem>>, %arg3: memref<1x24x128xf32, #tpu.memory_space<vmem>>) attributes {dimension_semantics = [#tpu.dimension_semantics<parallel>], iteration_bounds = array<i64: 2>, scalar_prefetch = 0 : i64, scratch_operands = 0 : i64, tpu.core_type = #tpu.core_type<tc>, window_params = [{transform_indices = @transform_0, window_bounds = array<i64: 8, 128>}, {transform_indices = @transform_1, window_bounds = array<i64: 8, 128>}, {transform_indices = @transform_2, window_bounds = array<i64: 1, 24, 128>}]} {
    %cst = arith.constant 0.000000e+00 : f32
    %0 = vector.broadcast %cst : f32 to vector<8x128xf32>
    %c0_i32 = arith.constant 0 : i32
    %c8_i32 = arith.constant 8 : i32
    %1 = arith.muli %c0_i32, %c8_i32 : i32
    %2 = tpu.assume_multiple %1, 8 : i32
    %3 = arith.index_cast %2 : i32 to index
    %c0 = arith.constant 0 : index
    %4 = vector.load %arg1[%3, %c0] : memref<8x128xf32, #tpu.memory_space<vmem>>, vector<8x128xf32>
    %5 = arith.index_cast %2 : i32 to index
    %c0_0 = arith.constant 0 : index
    %6 = vector.load %arg2[%5, %c0_0] : memref<8x128xf32, #tpu.memory_space<vmem>>, vector<8x128xf32>
    %7 = math.absf %4 : vector<8x128xf32>
    %cst_1 = arith.constant 0.000000e+00 : f32
    %8 = vector.broadcast %cst_1 : f32 to vector<8x128xf32>
    %9 = arith.subf %8, %7 : vector<8x128xf32>
    %10 = math.exp %9 : vector<8x128xf32>
    %cst_2 = arith.constant 1.000000e+00 : f32
    %11 = vector.broadcast %cst_2 : f32 to vector<8x128xf32>
    %12 = arith.addf %11, %10 : vector<8x128xf32>
    %cst_3 = arith.constant 1.000000e+00 : f32
    %13 = vector.broadcast %cst_3 : f32 to vector<8x128xf32>
    %14 = arith.divf %13, %12 : vector<8x128xf32>
    %cst_4 = arith.constant 0.000000e+00 : f32
    %15 = vector.broadcast %cst_4 : f32 to vector<8x128xf32>
    %16 = arith.cmpf oge, %4, %15 : vector<8x128xf32>
    %17 = arith.mulf %10, %14 : vector<8x128xf32>
    %18 = arith.select %16, %14, %17 : vector<8x128xi1>, vector<8x128xf32>
    %cst_5 = arith.constant 1.000000e+00 : f32
    %19 = vector.broadcast %cst_5 : f32 to vector<8x128xf32>
    %20 = arith.addf %19, %10 : vector<8x128xf32>
    %21 = math.log %20 : vector<8x128xf32>
    %cst_6 = arith.constant 0.000000e+00 : f32
    %22 = vector.broadcast %cst_6 : f32 to vector<8x128xf32>
    %23 = arith.maximumf %4, %22 : vector<8x128xf32>
    %24 = arith.addf %21, %23 : vector<8x128xf32>
    %25 = arith.mulf %6, %4 : vector<8x128xf32>
    %26 = arith.subf %24, %25 : vector<8x128xf32>
    %cst_7 = arith.constant 1.000000e+02 : f32
    %27 = vector.broadcast %cst_7 : f32 to vector<8x128xf32>
    %28 = arith.minimumf %26, %27 : vector<8x128xf32>
    %29 = arith.mulf %18, %6 : vector<8x128xf32>
    %30 = arith.addf %0, %29 : vector<8x128xf32>
    %31 = arith.addf %18, %6 : vector<8x128xf32>
    %32 = arith.addf %0, %31 : vector<8x128xf32>
    %33 = arith.addf %0, %28 : vector<8x128xf32>
    %c1_i32 = arith.constant 1 : i32
    %c0_8 = arith.constant 0 : index
    %c0_9 = arith.constant 0 : index
    %c0_10 = arith.constant 0 : index
    %34 = vector.load %arg3[%c0_8, %c0_9, %c0_10] : memref<1x24x128xf32, #tpu.memory_space<vmem>>, vector<1x8x128xf32>
    %35 = vector.shape_cast %34 : vector<1x8x128xf32> to vector<8x128xf32>
    %36 = vector.shape_cast %30 : vector<8x128xf32> to vector<1x8x128xf32>
    tpu.vector_store %arg3[%c0_8, %c0_9, %c0_10], %36 {strides = array<i32>} : memref<1x24x128xf32, #tpu.memory_space<vmem>>, vector<1x8x128xf32>,
    %c0_11 = arith.constant 0 : index
    %c8 = arith.constant 8 : index
    %c0_12 = arith.constant 0 : index
    %37 = vector.load %arg3[%c0_11, %c8, %c0_12] : memref<1x24x128xf32, #tpu.memory_space<vmem>>, vector<1x8x128xf32>
    %38 = vector.shape_cast %37 : vector<1x8x128xf32> to vector<8x128xf32>
    %39 = vector.shape_cast %32 : vector<8x128xf32> to vector<1x8x128xf32>
    tpu.vector_store %arg3[%c0_11, %c8, %c0_12], %39 {strides = array<i32>} : memref<1x24x128xf32, #tpu.memory_space<vmem>>, vector<1x8x128xf32>,
    %c0_13 = arith.constant 0 : index
    %c16 = arith.constant 16 : index
    %c0_14 = arith.constant 0 : index
    %40 = vector.load %arg3[%c0_13, %c16, %c0_14] : memref<1x24x128xf32, #tpu.memory_space<vmem>>, vector<1x8x128xf32>
    %41 = vector.shape_cast %40 : vector<1x8x128xf32> to vector<8x128xf32>
    %42 = vector.shape_cast %33 : vector<8x128xf32> to vector<1x8x128xf32>
    tpu.vector_store %arg3[%c0_13, %c16, %c0_14], %42 {strides = array<i32>} : memref<1x24x128xf32, #tpu.memory_space<vmem>>, vector<1x8x128xf32>,
    return
  }
  func.func @transform_0(%arg0: i32) -> (i32, i32) {
    %c0_i32 = arith.constant 0 : i32
    %c0_i32_0 = arith.constant 0 : i32
    return %arg0, %c0_i32 : i32, i32
  }
  func.func @transform_1(%arg0: i32) -> (i32, i32) {
    %c0_i32 = arith.constant 0 : i32
    %c0_i32_0 = arith.constant 0 : i32
    return %arg0, %c0_i32 : i32, i32
  }
  func.func @transform_2(%arg0: i32) -> (i32, i32, i32) {
    %c0_i32 = arith.constant 0 : i32
    %c0_i32_0 = arith.constant 0 : i32
    %c0_i32_1 = arith.constant 0 : i32
    return %arg0, %c0_i32, %c0_i32_0 : i32, i32, i32
  }
}

</mosaic_0001>

<bundles_post_ra>
// kernel: tpu_custom_call.1
= control target key start
LH: loop header
LB: loop body
LE: loop exit
PB: predicated region body
PF: predicated region fallthrough
CT: control target
= control target key end

     0   :  { %7 = vsyncpa [#allocation3], 0  ;;  %s771_s0 = inlined_call_operand.hbm [shape: f32[16,128], index: 0, kind: input, shape index: {}]   ;;  %s772_s1 = inlined_call_operand.hbm [shape: f32[16,128], index: 1, kind: input, shape index: {}]   ;;  %s773_s2 = inlined_call_operand.hbm [shape: f32[2,24,128], index: 2, kind: output, shape index: {}]  }
   0x1   :  { %9 = vsyncpa [#allocation3 + $0x1], 0 }
   0x2   :  { %10 = vsyncpa [#allocation6], 0 }
   0x3   :  { %12 = vsyncpa [#allocation6 + $0x1], 0 }
   0x4   :  { %13 = vsyncpa [#allocation4], 0 }
   0x5   :  { %15 = vsyncpa [#allocation4 + $0x1], 0  ;;  %s559_s9 = smov 0   ;;  %s561_s10 = smov 0  }
   0x6   :  { %s563_s11 = smov 0   ;;  %s565_s12 = smov 0  }
   0x7 LB: > { %s580_s13 = sadd.s32 4294967295, %s537_s12   ;;  %s333_s14 = sadd.s32 4294967294, %s537_s12   ;;  %s537_s12 = sphi %s565_s12, %s792_s12   ;;  %s533_s11 = sphi %s563_s11, %s791_s11   ;;  %s529_s10 = sphi %s561_s10, %s790_s10   ;;  %s525_s9 = sphi %s559_s9, %s789_s9  }
   0x8   : > { %s584_s15 = sadd.s32 1, %s537_s12   ;;  %s28_s16 = sadd.s32 1, %s533_s11 }
   0x9   : > { %s25_s17 = ssub.s32 %s537_s12, %s584_s15  ;;  %p35_p0 = scmp.ne.s32.totalorder %s533_s11, %s529_s10 }
   0xa   : > { %p26_p1 = scmp.eq.s32.totalorder %s25_s17, 0  ;;  %p36_p2 = scmp.eq.s32.totalorder %s537_s12, 0 }
   0xb   : > { %p41_p3 = scmp.ne.s32.totalorder %s529_s10, %s525_s9  ;;  %p42_p4 = scmp.eq.s32.totalorder %s580_s13, 0 }
   0xc   : > { %s596_s18 = scalar_select %p26_p1, %s533_s11, %s28_s16  }
   0xd   : > { %p598_p5 = por %p36_p2, %p35_p0  ;;  %p602_p6 = por %p42_p4, %p41_p3 }
   0xe   : > { %p91_p7 = scmp.eq.s32.totalorder %s580_s13, 1  ;;  %p97_p8 = scmp.eq.s32.totalorder %s333_s14, 1 }
   0xf   : > { %s777_s20 = scalar_select %p602_p6, 1, 0 }
  0x10   : > { %p365_p10 = scmp.lt.s32.totalorder %s537_s12, 2  ;;  %p609_p11 = por %p91_p7, %p35_p0 }
  0x11   : > { %p613_p12 = por %p97_p8, %p41_p3  ;;  %s618_s23 = sand.u32 1, %s533_s11  }
  0x12   : > { %s778_s21 = scalar_select %p609_p11, 1, 0 }
  0x13   : > { %s779_s22 = scalar_select %p613_p12, 1, 0 }
  0x14   : > { %s337_s24 = sshll.u32 %s537_s12, 7  ;;  %s336_s25 = sshll.u32 %s618_s23, 3 }
  0x15   : > { %s627_s28 = scalar_lea.hbm %s771_s0, %s337_s24  ;;  %s121_s29 = scalar_lea.vmem [#allocation2], %s336_s25 }
  0x16   : > { %s128_s30 = sshll.u32 %s121_s29, 4  ;;  %p633_p13 = pnand %p365_p10, %p598_p5  ;;  %s637_s30 = int_to_ptr.vmem [resolvable:$true] %s128_s30 }
  0x17   : > { %s118_s4 = scalar_lea.sflag [#allocation3], %s618_s23  ;;  %s407_s5 = scalar_lea.hbm %s627_s28, 128 }
  0x18   : > { %p408_p2 = scmp.ne.s32.totalorder %s627_s28, %s407_s5  ;;  %p409_p3 = pneg %p633_p13 }
  0x19   : > { %s412_s8 = scalar_lea.hbm %s771_s0, 256  ;;  %p413_p5 = scmp.lt.u32.totalorder %s627_s28, %s771_s0 }
  0x1a   : > { %p410_p4 = pnand %p409_p3, %p408_p2  ;;  %p414_p8 = scmp.lt.u32.totalorder %s412_s8, %s407_s5 }
  0x1b   : > { %p416_p9 = scmp.lt.u32.totalorder %s407_s5, %s627_s28 }
  0x1c   : > { %p411_p7 = pneg %p410_p4  ;;  %p415_p10 = por %p414_p8, %p413_p5 }
  0x1e   : > { %p417_p0 = por %p416_p9, %p415_p10 }
  0x20   : > { %p418_p1 = pnand %p417_p0, %p411_p7 }
  0x22   : > { %421 = shalt.err (!%p418_p1)
}
  0x23   : > { %s422_s17 = scalar_lea.vmem %s637_s30, 128  ;;  %s539_s19 = smov [#allocation2]  }
  0x24   : > { %p423_p2 = scmp.ne.s32.totalorder %s637_s30, %s422_s17  ;;  %s427_s26 = sshll.u32 %s539_s19, 4  ;;  %s428_s26 = int_to_ptr.vmem [resolvable:$false] %s427_s26 }
  0x25   : > { %s429_s27 = scalar_lea.vmem %s428_s26, 256  ;;  %p430_p11 = scmp.lt.s32.totalorder %s637_s30, %s428_s26 }
  0x26   : > { %p425_p4 = pnand %p423_p2, %p409_p3  ;;  %p431_p5 = scmp.lt.s32.totalorder %s429_s27, %s422_s17 }
  0x28   : > { %p426_p12 = pneg %p425_p4  ;;  %p432_p8 = por %p431_p5, %p430_p11 }
  0x2a   : > { %p433_p9 = pnand %p432_p8, %p426_p12 }
  0x2c   : > { %436 = shalt.err (!%p433_p9)
}
  0x2d   : > { %357 = dma.hbm_to_vmem [thread:$0]  (!%p633_p13), %s627_s28, 128, %s637_s30, %s118_s4  }
  0x2e   : > { %p781_p0 = scmp.lt.s32.totalorder %s537_s12, 3  ;;  %p782_p1 = scmp.ge.s32.totalorder %s537_s12, 1 }
  0x2f   : > { %s680_s7 = scalar_lea.hbm %s772_s1, %s337_s24  ;;  %s139_s8 = scalar_lea.vmem [#allocation5], %s336_s25 }
  0x30   : > { %p671_p7 = pnand %p782_p1, %p781_p0  ;;  %s146_s14 = sshll.u32 %s139_s8, 4  ;;  %s147_s14 = int_to_ptr.vmem [resolvable:$true] %s146_s14 }
  0x31   : > { %s136_s28 = scalar_lea.sflag [#allocation6], %s618_s23  ;;  %s437_s30 = scalar_lea.hbm %s680_s7, 128 }
  0x32   : > { %s783_s29 = scalar_select %p671_p7, 1, 0 }
  0x33   : > { %p438_p11 = scmp.ne.s32.totalorder %s680_s7, %s437_s30  ;;  %s442_s24 = scalar_lea.hbm %s772_s1, 256 }
  0x34   : > { %p443_p2 = scmp.lt.u32.totalorder %s680_s7, %s772_s1  ;;  %p444_p4 = scmp.lt.u32.totalorder %s442_s24, %s437_s30 }
  0x35   : > { %p440_p12 = pnand %p438_p11, %p409_p3  ;;  %p446_p8 = scmp.lt.u32.totalorder %s437_s30, %s680_s7 }
  0x36   : > { %p445_p5 = por %p444_p4, %p443_p2 }
  0x37   : > { %p441_p10 = pneg %p440_p12 }
  0x38   : > { %p447_p9 = por %p446_p8, %p445_p5 }
  0x3a   : > { %p448_p0 = pnand %p447_p9, %p441_p10 }
  0x3c   : > { %451 = shalt.err (!%p448_p0)
}
  0x3d   : > { %s452_s23 = scalar_lea.vmem %s147_s14, 128  ;;  %s540_s25 = smov [#allocation5]  }
  0x3e   : > { %p453_p1 = scmp.ne.s32.totalorder %s147_s14, %s452_s23  ;;  %s457_s26 = sshll.u32 %s540_s25, 4  ;;  %s458_s26 = int_to_ptr.vmem [resolvable:$false] %s457_s26 }
  0x3f   : > { %s459_s27 = scalar_lea.vmem %s458_s26, 256  ;;  %p460_p6 = scmp.lt.s32.totalorder %s147_s14, %s458_s26 }
  0x40   : > { %p455_p11 = pnand %p453_p1, %p409_p3  ;;  %p461_p7 = scmp.lt.s32.totalorder %s459_s27, %s452_s23 }
  0x42   : > { %p456_p12 = pneg %p455_p11  ;;  %p462_p2 = por %p461_p7, %p460_p6 }
  0x44   : > { %p463_p4 = pnand %p462_p2, %p456_p12 }
  0x46   : > { %466 = shalt.err (!%p463_p4)
}
  0x47   : > { %360 = dma.hbm_to_vmem [thread:$0]  (!%p633_p13), %s680_s7, 128, %s147_s14, %s136_s28  }
  0x48   : > { %p784_p10 = scmp.ne.s32.totalorder %s783_s29, 0 }
  0x49   : > { %s707_s5 = sand.u32 (!%p784_p10), 1, %s529_s10   ;;  %p785_p3 = scmp.ne.s32.totalorder (!%p784_p10), %s777_s20, 0 }
  0x4a   : > { %155 = sbr.rel (%p784_p10) target bundleno = 139 (0x8b), region = 28  ;;  %s341_s6 = sshll.u32 (!%p784_p10), %s707_s5, 3 }
  0x4b   : > { %s158_s8 = scalar_lea.sflag (!%p784_p10), [#allocation3], %s707_s5  ;;  %s161_s30 = scalar_lea.vmem (!%p784_p10), [#allocation2], %s341_s6 }
  0x51   : > { %512 = dma.done.wait (%p785_p3), %s158_s8, 128  }
  0x52   : > { %514 = vsyncadd (%p785_p3), %s158_s8, 4294967168  ;;  %s167_s3 = scalar_lea.sflag [#allocation6], %s707_s5  ;;  %s170_s7 = scalar_lea.vmem [#allocation5], %s341_s6 }
  0x53   : > { %516 = dma.done.wait (%p785_p3), %s167_s3, 128  }
  0x54   : > { %518 = vsyncadd (%p785_p3), %s167_s3, 4294967168  ;;  %v196_v0 = vld [vmem:[%s161_s30] sm:$0xff]  ;;  %s346_s29 = smul.u32 24, %s707_s5  ;;  %v197_v6 = vld [vmem:[%s170_s7] sm:$0xff]  ;;  %s224_s17 = scalar_lea.sflag [#allocation4], %s707_s5 }
  0x55   : > { %v198_v1 = vand.u32 2147483647, %v196_v0  ;;  %vm205_vm0 = vcmp.ge.f32.partialorder %v196_v0, 0.0  ;;  %v210_v8 = vmax.f32 %v196_v0, 0.0  ;;  %v212_v12 = vmul.f32 %v197_v6, %v196_v0  ;;  %s347_s20 = smul.u32 384, %s580_s13  ;;  %p786_p13 = scmp.ne.s32.totalorder %s778_s21, 0 }
  0x56   : > { %s195_s14 = scalar_lea.vmem [#allocation7], %s346_s29  ;;  %s541_s13 = smov [#allocation7]  }
  0x57   : > { %v199_v2 = vsub.f32 0.0, %v198_v1  ;;  %s237_s28 = sshll.u32 %s195_s14, 4  ;;  %s727_s24 = scalar_lea.hbm %s773_s2, %s347_s20  ;;  %s722_s28 = int_to_ptr.vmem [resolvable:$true] %s237_s28 }
  0x58   : > { %s467_s19 = scalar_lea.vmem %s722_s28, 384  ;;  %s471_s23 = sshll.u32 %s541_s13, 4  ;;  %s472_s23 = int_to_ptr.vmem [resolvable:$false] %s471_s23 }
  0x59   : > { %v200_v3 = vmul.f32 1.442695, %v199_v2  ;;  %p468_p6 = scmp.ne.s32.totalorder %s722_s28, %s467_s19  ;;  %s473_s25 = scalar_lea.vmem %s472_s23, 768 }
  0x5a   : > { %p474_p8 = scmp.lt.s32.totalorder %s722_s28, %s472_s23  ;;  %p475_p9 = scmp.lt.s32.totalorder %s473_s25, %s467_s19 }
  0x5b   : > { %401 = vpow2.f32 %v200_v3  ;;  %p469_p7 = pnand %p468_p6, %p786_p13 }
  0x5c   : > { %p476_p0 = por %p475_p9, %p474_p8 }
  0x5d   : > { %p470_p5 = pneg %p469_p7 }
  0x5f   : > { %p477_p1 = pnand %p476_p0, %p470_p5 }
  0x65   : > { %v402_v4 = vpop.eup %401 }
  0x66   : > { %v202_v5 = vadd.f32 1.0, %v402_v4 }
  0x68   : > { %403 = vrcp.f32 %v202_v5 }
  0x69   : > { %405 = vlog2.f32 %v202_v5 }
  0x72   : > { %v404_v7 = vpop.eup %403 }
  0x73   : > { %v406_v9 = vpop.eup %405  ;;  %v206_v10 = vmul.f32 %v404_v7, %v402_v4 }
  0x74   : > { %v209_v11 = vmul.f32 0.6931472, %v406_v9 }
  0x75   : > { %v207_v13 = vsel %vm205_vm0, %v404_v7, %v206_v10 }
  0x76   : > { %v215_v14 = vmul.f32 %v207_v13, %v197_v6  ;;  %v217_v15 = vadd.f32 %v207_v13, %v197_v6  ;;  %v211_v16 = vadd.f32 %v210_v8, %v209_v11 }
  0x78   : > { %220 = vst [vmem:[%s195_s14] sm:$0xff] %v215_v14  ;;  %221 = vst [vmem:[%s195_s14 + $0x8] sm:$0xff] %v217_v15  ;;  %v213_v17 = vsub.f32 %v211_v16, %v212_v12 }
  0x7a   : > { %v214_v18 = vmin.f32 %v213_v17, 100.0 }
  0x7c   : > { %222 = vst [vmem:[%s195_s14 + $0x10] sm:$0xff] %v214_v18 }
  0x7d   : > { %480 = shalt.err (!%p477_p1)
}
  0x7e   : > { %s481_s26 = scalar_lea.hbm %s727_s24, 384  ;;  %s485_s8 = scalar_lea.hbm %s773_s2, 768 }
  0x7f   : > { %p482_p11 = scmp.ne.s32.totalorder %s727_s24, %s481_s26  ;;  %p486_p4 = scmp.lt.u32.totalorder %s727_s24, %s773_s2 }
  0x80   : > { %p487_p10 = scmp.lt.u32.totalorder %s485_s8, %s481_s26  ;;  %p489_p6 = scmp.lt.u32.totalorder %s481_s26, %s727_s24 }
  0x81   : > { %p483_p12 = pnand %p482_p11, %p786_p13 }
  0x82   : > { %p488_p3 = por %p487_p10, %p486_p4 }
  0x83   : > { %p484_p2 = pneg %p483_p12 }
  0x84   : > { %p490_p7 = por %p489_p6, %p488_p3 }
  0x86   : > { %p491_p5 = pnand %p490_p7, %p484_p2 }
  0x88   : > { %494 = shalt.err (!%p491_p5)
}
  0x89   : > { %s542_s7 = smov 128   ;;  %s543_s29 = smov 8  }
  0x8a   : > { %352 = dma.vmem_to_hbm [thread:$0]  (%p786_p13), %s722_s28, 384, %s727_s24, %s224_s17, %s542_s7, %s542_s7, %s543_s29  }
  0x8b PF: > { %s252_s20 = sand.u32 1, %s525_s9   ;;  %p787_p8 = scmp.ne.s32.totalorder %s779_s22, 0 }
  0x8c   : > { %p788_p9 = scmp.ge.s32.totalorder %s537_s12, 2  ;;  %s253_s14 = scalar_lea.sflag [#allocation4], %s252_s20 }
  0x8e   : > { %p362_p0 = pnand %p788_p9, %p787_p8 }
  0x90   : > { %520 = dma.done.wait (!%p362_p0), %s253_s14, 384  }
  0x91   : > { %522 = vsyncadd (!%p362_p0), %s253_s14, 4294966912  ;;  %p18_p1 = scmp.ge.s32.totalorder %s584_s15, 4   ;;  %s789_s9 = smov %s529_s10 }
  0x92   : > { %s790_s10 = smov %s533_s11  ;;  %s791_s11 = smov %s596_s18 }
  0x93   : > { %s792_s12 = smov %s584_s15  ;;  %20 = sbr.rel (!%p18_p1) target bundleno = 7 (0x7), region = 86 }
  0x9a   :  { %258 = vsyncpa [#allocation3], 1 }
  0x9b   :  { %260 = vsyncpa [#allocation3 + $0x1], 1 }
  0x9c   :  { %261 = vsyncpa [#allocation6], 1 }
  0x9d   :  { %263 = vsyncpa [#allocation6 + $0x1], 1 }
  0x9e   :  { %264 = vsyncpa [#allocation4], 1 }
  0x9f   :  { %266 = vsyncpa [#allocation4 + $0x1], 1 }

</bundles_post_ra>
